<compile_context>
chip_gen: v7x
topology: tpu7x:2x2x1
jax: 0.10.0
libtpu: 0.0.40
codegen_flags: <defaults>
</compile_context>

<pallas_src>
import jax
import jax.numpy as jnp
from jax.experimental import pallas as pl
from jax.experimental.pallas import tpu as pltpu


def _gated_conv_kernel(p_ref, w_ref, b_ref, o_ref):
    # p_ref: (Kp, tile)  im2col patches for one batch tile, M on lanes (streamed)
    # w_ref: (2N, Kp)    conv weights stacked over gate weights (resident)
    # b_ref: (2N, 1)     conv bias stacked over gate bias, f32 (resident)
    # o_ref: (N, tile)   gated output, M on lanes (unmasked lane-dense store)
    n = o_ref.shape[0]
    # One fused MXU pass computes both the conv and the gate pre-activations.
    acc = jnp.dot(w_ref[...], p_ref[...], preferred_element_type=jnp.float32)
    acc = acc + b_ref[...]                         # f32 bias add, lane broadcast
    conv = acc[:n, :]                              # N multiple of 8 keeps this
    gate = acc[n:, :]                              # split vreg-aligned (f32)
    o_ref[...] = (conv * jax.nn.sigmoid(gate)).astype(o_ref.dtype)


def _im2col_nchw(x_pad, kh, kw, sh, sw):
    """x_pad: (B, C, Hp, Wp) -> patches (B, C*kh*kw, Ho*Wo).

    K ordered (C, kh, kw) to match weight.reshape(N, C*kh*kw); per-batch
    M = Ho*Wo is placed LAST so it lands on the lane dim, and the batch dim is
    kept leading so the kernel output comes out directly in NCHW order."""
    B, C, Hp, Wp = x_pad.shape
    Ho = (Hp - kh) // sh + 1
    Wo = (Wp - kw) // sw + 1
    taps = []
    for i in range(kh):
        for j in range(kw):
            taps.append(
                x_pad[:, :, i: i + sh * (Ho - 1) + 1: sh,
                            j: j + sw * (Wo - 1) + 1: sw]
            )
    p = jnp.stack(taps, axis=2)                    # (B, C, kh*kw, Ho, Wo)
    return p.reshape(B, C * kh * kw, Ho * Wo), Ho, Wo


def _round_up(x, m):
    return ((x + m - 1) // m) * m


def _vmem_estimate(kp, n, tile, op_bytes, out_bytes):
    """Rough double-buffered VMEM footprint of one grid step."""
    return (2 * kp * tile * op_bytes        # patch tile (double-buffered)
            + 2 * n * tile * out_bytes      # output tile (double-buffered)
            + 2 * 2 * n * kp * op_bytes     # fused weights (resident)
            + 2 * 2 * n * 4)                # fused bias


def _pick_tile_m(mb, tile_m, kp, n, op_bytes, out_bytes, vmem_budget):
    """Largest multiple-of-128 tile <= tile_m that fits the VMEM budget.

    No forced >=2-grid-step split: the batch grid axis + natural M tiling
    already provide parallel steps for v7x megacore; splitting tiny M only
    doubles per-step overhead on single-TC v5e/v6e."""
    mb128 = _round_up(mb, 128)
    tile = max(128, (min(tile_m, mb128) // 128) * 128)
    while tile > 128 and _vmem_estimate(kp, n, tile, op_bytes, out_bytes) > vmem_budget:
        tile -= 128
    return tile


def gate_conv_padding(x, wc, bc, wg, bg, stride, *, tile_m=4096,
                      compute_dtype=jnp.bfloat16, out_dtype=None,
                      vmem_budget_bytes=24 * 1024 * 1024):
    """Gate_Conv_padding forward (de_flag=0): conv(pad(x)) * sigmoid(gate_conv(pad(x))).

    x: (B, C, T, F) NCHW; wc/wg: (N, C, kh, kw); bc/bg: (N,).
    compute_dtype: dtype of the matmul operands (bf16 halves HBM/VMEM traffic
      and doubles the MXU rate on v6e/v7x); accumulation, bias, sigmoid and the
      gating product stay f32.  Use jnp.float32 for an exact path.
    out_dtype: output dtype (defaults to x.dtype); bf16 halves writeback bytes.
    """
    B, C, H, W = x.shape
    N, _, kh, kw = wc.shape
    sh, sw = stride
    out_dtype = x.dtype if out_dtype is None else out_dtype
    op_bytes = jnp.dtype(compute_dtype).itemsize
    out_bytes = jnp.dtype(out_dtype).itemsize

    # ConstantPad2d((1, 1, 0, 0)): pad the last (freq) dim by 1 on each side.
    x_pad = jnp.pad(x, ((0, 0), (0, 0), (0, 0), (1, 1)))

    # Lane-dense per-batch im2col: (B, K, Mb) with Mb = Ho*Wo on the minor dim.
    patches, Ho, Wo = _im2col_nchw(x_pad, kh, kw, sh, sw)
    K = C * kh * kw
    Mb = Ho * Wo

    # Make the K padding to the dtype sublane packing explicit (16 rows/vreg
    # for bf16, 8 for f32, 32 for fp8) so streamed patch DMAs stay dense.
    k_mult = 8 * max(1, 4 // op_bytes)
    Kp = _round_up(K, k_mult)

    tile = _pick_tile_m(Mb, tile_m, Kp, N, op_bytes, out_bytes, vmem_budget_bytes)
    Mb_pad = _round_up(Mb, tile)

    # Pad K and M and cast inside the same fusion that materializes the patches.
    patches = jnp.pad(patches, ((0, 0), (0, Kp - K), (0, Mb_pad - Mb)))
    patches = patches.astype(compute_dtype)

    # Fuse conv + gate weights/biases so each patch tile streams through the MXU once.
    w_fused = jnp.concatenate([wc.reshape(N, K), wg.reshape(N, K)], axis=0)
    w_fused = jnp.pad(w_fused, ((0, 0), (0, Kp - K))).astype(compute_dtype)   # (2N, Kp)
    b_fused = jnp.concatenate([bc, bg]).astype(jnp.float32).reshape(2 * N, 1)

    # Explicit scoped-VMEM limit: big tiles would otherwise trip v5e's 16 MiB
    # (and potentially v7x's 32 MiB) default; keep well under v7x's 64 MiB phys.
    vmem_est = _vmem_estimate(Kp, N, tile, op_bytes, out_bytes)
    vmem_limit = int(min(64 * 1024 * 1024,
                         max(16 * 1024 * 1024, int(vmem_est * 1.5) + (2 << 20))))

    out = pl.pallas_call(
        _gated_conv_kernel,
        out_shape=jax.ShapeDtypeStruct((B, N, Mb_pad), out_dtype),
        grid_spec=pltpu.PrefetchScalarGridSpec(
            num_scalar_prefetch=0,
            grid=(B, Mb_pad // tile),
            in_specs=[
                pl.BlockSpec((None, Kp, tile), lambda b, i: (b, 0, i)),  # patches (streamed)
                pl.BlockSpec((2 * N, Kp), lambda b, i: (0, 0)),          # fused weights (resident)
                pl.BlockSpec((2 * N, 1), lambda b, i: (0, 0)),           # fused bias (resident)
            ],
            out_specs=pl.BlockSpec((None, N, tile), lambda b, i: (b, 0, i)),
        ),
        compiler_params=pltpu.CompilerParams(
            dimension_semantics=("parallel", "parallel"),
            vmem_limit_bytes=vmem_limit),
    )(patches, w_fused, b_fused)

    # Output is already channel-ordered NCHW; just drop the padded M columns
    # (they hold bias*sigmoid(bias), not zeros) and unflatten (Ho, Wo).
    return out[:, :, :Mb].reshape(B, N, Ho, Wo)


def _ref_forward(x, wc, bc, wg, bg, stride):
    """Plain-JAX reference matching the PyTorch module semantics (de_flag=0)."""
    xp = jnp.pad(x, ((0, 0), (0, 0), (0, 0), (1, 1)))
    dn = ("NCHW", "OIHW", "NCHW")
    c = jax.lax.conv_general_dilated(xp, wc, window_strides=stride,
                                     padding="VALID", dimension_numbers=dn)
    c = c + bc[None, :, None, None]
    g = jax.lax.conv_general_dilated(xp, wg, window_strides=stride,
                                     padding="VALID", dimension_numbers=dn)
    g = g + bg[None, :, None, None]
    return c * jax.nn.sigmoid(g)


if __name__ == "__main__":
    key = jax.random.PRNGKey(0)
    B, Cin, Cout = 2, 4, 8
    T, F = 16, 16            # (time, freq) spatial dims
    kh, kw = 2, 3            # kernel_size = (2, 3), typical GCRN encoder
    stride = (1, 2)          # stride = (1, 2)

    k1, k2, k3, k4, k5 = jax.random.split(key, 5)
    x = jax.random.normal(k1, (B, Cin, T, F), jnp.float32)

    fan_in = Cin * kh * kw
    bound = 1.0 / (fan_in ** 0.5)
    wc = jax.random.uniform(k2, (Cout, Cin, kh, kw), jnp.float32, -bound, bound)
    bc = jax.random.uniform(k3, (Cout,), jnp.float32, -bound, bound)
    wg = jax.random.uniform(k4, (Cout, Cin, kh, kw), jnp.float32, -bound, bound)
    bg = jax.random.uniform(k5, (Cout,), jnp.float32, -bound, bound)

    ref = _ref_forward(x, wc, bc, wg, bg, stride)

    # Exact path (f32 operands) -- tight check of the module semantics.
    out_f32 = gate_conv_padding(x, wc, bc, wg, bg, stride,
                                compute_dtype=jnp.float32)
    out_f32 = jax.block_until_ready(out_f32)
    assert out_f32.shape == ref.shape, (out_f32.shape, ref.shape)
    assert jnp.allclose(out_f32, ref, atol=1e-4, rtol=1e-4)

    # Default fast path (bf16 matmul operands, f32 accumulate + epilogue).
    out_bf16 = gate_conv_padding(x, wc, bc, wg, bg, stride)
    out_bf16 = jax.block_until_ready(out_bf16)
    assert out_bf16.shape == ref.shape, (out_bf16.shape, ref.shape)
    assert jnp.allclose(out_bf16, ref, atol=5e-2, rtol=5e-2)

    # bf16 output option (halves writeback bytes for downstream bf16 layers).
    out_bf16_out = gate_conv_padding(x, wc, bc, wg, bg, stride,
                                     out_dtype=jnp.bfloat16)
    out_bf16_out = jax.block_until_ready(out_bf16_out)
    assert out_bf16_out.shape == ref.shape
    assert jnp.allclose(out_bf16_out.astype(jnp.float32), ref,
                        atol=5e-2, rtol=5e-2)

    print("KERNEL_OK")
</pallas_src>

<mosaic_0001>
module attributes {stable_mosaic.version = 11 : i64} {
  func.func @_gated_conv_kernel(%arg0: i32, %arg1: i32, %arg2: memref<1x24x128xf32, #tpu.memory_space<vmem>>, %arg3: memref<16x24xf32, #tpu.memory_space<vmem>>, %arg4: memref<16x1xf32, #tpu.memory_space<vmem>>, %arg5: memref<1x8x128xf32, #tpu.memory_space<vmem>>) attributes {dimension_semantics = [#tpu.dimension_semantics<parallel>, #tpu.dimension_semantics<parallel>], iteration_bounds = array<i64: 2, 1>, scalar_prefetch = 0 : i64, scratch_operands = 0 : i64, tpu.core_type = #tpu.core_type<tc>, window_params = [{transform_indices = @transform_0, window_bounds = array<i64: 1, 24, 128>}, {pipeline_mode = #tpu.pipeline_mode<synchronous>, transform_indices = @transform_1, window_bounds = array<i64: 16, 24>}, {pipeline_mode = #tpu.pipeline_mode<synchronous>, transform_indices = @transform_2, window_bounds = array<i64: 16, 1>}, {transform_indices = @transform_3, window_bounds = array<i64: 1, 8, 128>}]} {
    %c0 = arith.constant 0 : index
    %c0_0 = arith.constant 0 : index
    %0 = vector.load %arg3[%c0, %c0_0] : memref<16x24xf32, #tpu.memory_space<vmem>>, vector<16x24xf32>
    %c0_1 = arith.constant 0 : index
    %c0_2 = arith.constant 0 : index
    %c0_3 = arith.constant 0 : index
    %1 = vector.load %arg2[%c0_1, %c0_2, %c0_3] : memref<1x24x128xf32, #tpu.memory_space<vmem>>, vector<1x24x128xf32>
    %2 = vector.shape_cast %1 : vector<1x24x128xf32> to vector<24x128xf32>
    %cst = arith.constant dense<0.000000e+00> : vector<16x128xf32>
    %3 = tpu.matmul %0, %2, %cst {dimension_numbers = #tpu.dot_dimension_numbers<[1], [0], [0], [1], [0, 0, 1, 1], [], []>} : vector<16x24xf32>, vector<24x128xf32>, vector<16x128xf32> -> vector<16x128xf32>
    %c0_4 = arith.constant 0 : index
    %c0_5 = arith.constant 0 : index
    %4 = vector.load %arg4[%c0_4, %c0_5] : memref<16x1xf32, #tpu.memory_space<vmem>>, vector<16x1xf32>
    %5 = vector.broadcast %4 : vector<16x1xf32> to vector<16x128xf32>
    %6 = arith.addf %3, %5 : vector<16x128xf32>
    %7 = vector.extract_strided_slice %6 {offsets = [0, 0], sizes = [8, 128], strides = [1, 1]} : vector<16x128xf32> to vector<8x128xf32>
    %8 = vector.extract_strided_slice %6 {offsets = [8, 0], sizes = [8, 128], strides = [1, 1]} : vector<16x128xf32> to vector<8x128xf32>
    %9 = arith.negf %8 : vector<8x128xf32>
    %10 = math.exp %9 : vector<8x128xf32>
    %cst_6 = arith.constant 1.000000e+00 : f32
    %11 = vector.broadcast %cst_6 : f32 to vector<8x128xf32>
    %12 = arith.addf %11, %10 : vector<8x128xf32>
    %13 = arith.divf %11, %12 : vector<8x128xf32>
    %14 = arith.mulf %7, %13 : vector<8x128xf32>
    %c0_7 = arith.constant 0 : index
    %c0_8 = arith.constant 0 : index
    %c0_9 = arith.constant 0 : index
    %15 = vector.load %arg5[%c0_7, %c0_8, %c0_9] : memref<1x8x128xf32, #tpu.memory_space<vmem>>, vector<1x8x128xf32>
    %16 = vector.shape_cast %15 : vector<1x8x128xf32> to vector<8x128xf32>
    %17 = vector.shape_cast %14 : vector<8x128xf32> to vector<1x8x128xf32>
    tpu.vector_store %arg5[%c0_7, %c0_8, %c0_9], %17 {strides = array<i32>} : memref<1x8x128xf32, #tpu.memory_space<vmem>>, vector<1x8x128xf32>,
    return
  }
  func.func @transform_0(%arg0: i32, %arg1: i32) -> (i32, i32, i32) {
    %c0_i32 = arith.constant 0 : i32
    %c0_i32_0 = arith.constant 0 : i32
    return %arg0, %c0_i32, %arg1 : i32, i32, i32
  }
  func.func @transform_1(%arg0: i32, %arg1: i32) -> (i32, i32) {
    %c0_i32 = arith.constant 0 : i32
    %c0_i32_0 = arith.constant 0 : i32
    %c0_i32_1 = arith.constant 0 : i32
    return %c0_i32, %c0_i32_0 : i32, i32
  }
  func.func @transform_2(%arg0: i32, %arg1: i32) -> (i32, i32) {
    %c0_i32 = arith.constant 0 : i32
    %c0_i32_0 = arith.constant 0 : i32
    %c0_i32_1 = arith.constant 0 : i32
    return %c0_i32, %c0_i32_0 : i32, i32
  }
  func.func @transform_3(%arg0: i32, %arg1: i32) -> (i32, i32, i32) {
    %c0_i32 = arith.constant 0 : i32
    %c0_i32_0 = arith.constant 0 : i32
    return %arg0, %c0_i32, %arg1 : i32, i32, i32
  }
}

</mosaic_0001>

<bundles_post_ra>
// kernel: tpu_custom_call.1
= control target key start
LH: loop header
LB: loop body
LE: loop exit
PB: predicated region body
PF: predicated region fallthrough
CT: control target
= control target key end

     0   :  { %8 = vsyncpa [#allocation3], 0  ;;  %s841_s0 = inlined_call_operand.hbm [shape: f32[2,24,128], index: 0, kind: input, shape index: {}]   ;;  %s842_s1 = inlined_call_operand.vmem [shape: f32[16,24], index: 1, kind: input, shape index: {}]   ;;  %s843_s2 = inlined_call_operand.vmem [shape: f32[16,1], index: 2, kind: input, shape index: {}]   ;;  %s844_s3 = inlined_call_operand.hbm [shape: f32[2,8,128], index: 3, kind: output, shape index: {}]  }
   0x1   :  { %10 = vsyncpa [#allocation3 + $0x1], 0 }
   0x2   :  { %11 = vsyncpa [#allocation4], 0 }
   0x3   :  { %13 = vsyncpa [#allocation4 + $0x1], 0  ;;  %s653_s12 = smov 0   ;;  %s655_s13 = smov 0  }
   0x4   :  { %s657_s14 = smov 0   ;;  %s659_s15 = smov 0  }
   0x5   :  { %s661_s16 = smov 0   ;;  %s663_s17 = smov 0  }
   0x6 LB: > { %s409_s18 = sadd.s32 4294967295, %s626_s17   ;;  %s410_s19 = sadd.s32 4294967294, %s626_s17   ;;  %s626_s17 = sphi %s663_s17, %s19_s17   ;;  %s622_s16 = sphi %s661_s16, %s859_s16   ;;  %s618_s15 = sphi %s659_s15, %s858_s15   ;;  %s614_s14 = sphi %s657_s14, %s857_s14   ;;  %s610_s13 = sphi %s655_s13, %s856_s13   ;;  %s606_s12 = sphi %s653_s12, %s855_s12  }
   0x7   : > { %s31_s20 = sadd.s32 1, %s622_s16  ;;  %s40_s21 = sadd.s32 1, %s614_s14 }
   0x8   : > { %p33_p0 = scmp.ge.s32.totalorder %s31_s20, 2  ;;  %p47_p1 = scmp.ne.s32.totalorder %s614_s14, %s610_s13 }
   0x9   : > { %p48_p2 = scmp.eq.s32.totalorder %s626_s17, 0  ;;  %p53_p3 = scmp.ne.s32.totalorder %s610_s13, %s606_s12 }
   0xa   : > { %s861_s20 = smov (%p33_p0, %s31_s20), 0  ;;  %p54_p5 = scmp.eq.s32.totalorder %s409_s18, 0 }
   0xb   : > { %p694_p4 = por %p48_p2, %p47_p1  ;;  %s35_s23 = ssub.s32 %s622_s16, %s861_s20 }
   0xc   : > { %p121_p6 = scmp.eq.s32.totalorder %s409_s18, 1  ;;  %p38_p7 = scmp.eq.s32.totalorder %s35_s23, 0 }
   0xd   : > { %p700_p8 = por %p54_p5, %p53_p3  ;;  %p127_p10 = scmp.eq.s32.totalorder %s410_s19, 1 }
   0xe   : > { %p704_p9 = por %p121_p6, %p47_p1  ;;  %p456_p13 = scmp.lt.s32.totalorder %s626_s17, 2 }
   0xf   : > { %s709_s26 = scalar_select %p38_p7, %s614_s14, %s40_s21  }
  0x10   : > { %s848_s25 = scalar_select %p704_p9, 1, 0 }
  0x11   : > { %p711_p11 = por %p127_p10, %p53_p3  ;;  %s153_s28 = sand.u32 1, %s614_s14  }
  0x12   : > { %s441_s29 = smul.u32 24, %s153_s28  ;;  %p721_p0 = pnand %p456_p13, %p694_p4 }
  0x13   : > { %s849_s27 = scalar_select %p711_p11, 1, 0 }
  0x14   : > { %s442_s30 = smul.u32 384, %s622_s16  ;;  %s157_s8 = scalar_lea.vmem [#allocation2], %s441_s29 }
  0x15   : > { %s165_s9 = sshll.u32 %s157_s8, 4  ;;  %s733_s10 = scalar_lea.sflag [#allocation3], %s153_s28  ;;  %s730_s9 = int_to_ptr.vmem [resolvable:$true] %s165_s9 }
  0x16   : > { %s728_s7 = scalar_lea.hbm %s841_s0, %s442_s30  ;;  %p516_p3 = pneg %p721_p0 }
  0x17   : > { %s514_s11 = scalar_lea.hbm %s728_s7, 384  ;;  %s519_s21 = scalar_lea.hbm %s841_s0, 768 }
  0x18   : > { %p515_p2 = scmp.ne.s32.totalorder %s728_s7, %s514_s11  ;;  %p520_p6 = scmp.lt.u32.totalorder %s728_s7, %s841_s0 }
  0x19   : > { %p521_p7 = scmp.lt.u32.totalorder %s519_s21, %s514_s11  ;;  %p523_p13 = scmp.lt.u32.totalorder %s514_s11, %s728_s7 }
  0x1a   : > { %p517_p4 = pnand %p516_p3, %p515_p2 }
  0x1b   : > { %p522_p10 = por %p521_p7, %p520_p6 }
  0x1c   : > { %p518_p5 = pneg %p517_p4 }
  0x1d   : > { %p524_p12 = por %p523_p13, %p522_p10 }
  0x1f   : > { %p525_p1 = pnand %p524_p12, %p518_p5 }
  0x21   : > { %528 = shalt.err (!%p525_p1)
}
  0x22   : > { %s529_s28 = scalar_lea.vmem %s730_s9, 384  ;;  %s628_s29 = smov [#allocation2]  }
  0x23   : > { %p530_p2 = scmp.ne.s32.totalorder %s730_s9, %s529_s28  ;;  %s534_s30 = sshll.u32 %s628_s29, 4  ;;  %s535_s30 = int_to_ptr.vmem [resolvable:$false] %s534_s30 }
  0x24   : > { %s536_s5 = scalar_lea.vmem %s535_s30, 768  ;;  %p537_p9 = scmp.lt.s32.totalorder %s730_s9, %s535_s30 }
  0x25   : > { %p532_p4 = pnand %p530_p2, %p516_p3  ;;  %p538_p6 = scmp.lt.s32.totalorder %s536_s5, %s529_s28 }
  0x27   : > { %p533_p11 = pneg %p532_p4  ;;  %p539_p7 = por %p538_p6, %p537_p9 }
  0x29   : > { %p540_p10 = pnand %p539_p7, %p533_p11 }
  0x2b   : > { %543 = shalt.err (!%p540_p10)
}
  0x2c   : > { %s629_s6 = smov 128   ;;  %s630_s8 = smov 8  }
  0x2d   : > { %451 = dma.hbm_to_vmem [thread:$0]  (!%p721_p0), %s728_s7, 384, %s730_s9, %s733_s10, %s629_s6, %s629_s6, %s630_s8  }
  0x2e   : > { %p173_p12 = scmp.lt.s32.totalorder %s626_s17, 3  ;;  %p851_p1 = scmp.ge.s32.totalorder %s626_s17, 1 }
  0x30   : > { %p174_p3 = pnand %p851_p1, %p173_p12 }
  0x31   : > { %s765_s11 = sand.u32 (!%p174_p3), 1, %s610_s13  }
  0x32   : > { %177 = sbr.rel (%p174_p3) target bundleno = 323 (0x143), region = 32  ;;  %s180_s19 = scalar_lea.sflag (!%p174_p3), [#allocation3], %s765_s11 }
  0x33   : > { %s443_s18 = smul.u32 (!%p174_p3), 24, %s765_s11 }
  0x35   : > { %s183_s21 = scalar_lea.vmem (!%p174_p3), [#allocation2], %s443_s18 }
  0x39   : > { %597 = dma.done.wait (%p700_p8), %s180_s19, 384  }
  0x3a   : > { %599 = vsyncadd (%p700_p8), %s180_s19, 4294966912  ;;  %v631_v0 = vmov 0   ;;  %vm223_vm0 = vcmask 195584   ;;  %v208_v1 = vld [vmem:[%s183_s21] sm:$0xff]  ;;  %v209_v2 = vld [vmem:[%s183_s21 + $0x8] sm:$0xff]  ;;  %s415_s29 = sshll.u32 %s765_s11, 3 }
  0x3b   : > { %509 = vset.pattern.permute.xlu0 %v631_v0  ;;  %v437_v3 = vpack.c.bf16 %v209_v2, %v208_v1  ;;  %v206_v4 = vld [vmem:[%s842_s1] sm:$0xff]  ;;  %v212_v5 = vld [vmem:[%s843_s2 + $0x8] sm:$0xff]  ;;  %s420_s30 = sshll.u32 %s618_s15, 7  ;;  %s205_s5 = scalar_lea.vmem [#allocation5], %s415_s29 }
  0x3c   : > { %v210_v6 = vld [vmem:[%s183_s21 + $0x10] sm:$0xff]  ;;  %434 = vmatprep.mubr.msk.f32.mxu0 %vm223_vm0, %v206_v4  ;;  %220 = vperm.xlu0 %509, %v212_v5   ;;  %v211_v7 = vld [vmem:[%s843_s2] sm:$0xff]  ;;  %s328_s6 = sshll.u32 %s205_s5, 4  ;;  %s792_s19 = scalar_lea.hbm %s844_s3, %s420_s30  ;;  %s794_s6 = int_to_ptr.vmem [resolvable:$true] %s328_s6 }
  0x3d   : > { %438 = vmatprep.subr.bf16.mxu0 %v437_v3  ;;  %v207_v8 = vld [vmem:[%s842_s1 + $0x8] sm:$0xff]  ;;  %s314_s21 = scalar_lea.sflag [#allocation4], %s765_s11  ;;  %s544_s4 = scalar_lea.vmem %s794_s6, 128 }
  0x3e   : > { %440 = vmatpush3.bf16.msra.mxu0 %v437_v3  ;;  %p545_p8 = scmp.ne.s32.totalorder %s794_s6, %s544_s4  ;;  %p852_p9 = scmp.ne.s32.totalorder %s848_s25, 0 }
  0x3f   : > { %432 = vmatprep.subr.mxu0 %v210_v6  ;;  %s632_s15 = smov [#allocation5]  }
  0x40   : > { %215 = vperm.xlu0 %509, %v211_v7   ;;  %p546_p11 = pnand %p545_p8, %p852_p9  ;;  %s548_s7 = sshll.u32 %s632_s15, 4  ;;  %s549_s7 = int_to_ptr.vmem [resolvable:$false] %s548_s7 }
  0x41   : > { %s550_s9 = scalar_lea.vmem %s549_s7, 256  ;;  %p551_p5 = scmp.lt.s32.totalorder %s794_s6, %s549_s7 }
  0x42   : > { %433 = vmatpush3.msra.mxu0 %v210_v6  ;;  %p547_p0 = pneg %p546_p11  ;;  %p552_p13 = scmp.lt.s32.totalorder %s550_s9, %s544_s4 }
  0x43   : > { %435 = vmatmul.mubr.msk.f32.vlgmr.msra.gmra.mrb[0].mxu0 %vm223_vm0, %v207_v8 }
  0x44   : > { %p553_p2 = por %p552_p13, %p551_p5 }
  0x46   : > { %p554_p4 = pnand %p553_p2, %p547_p0 }
  0xbb   : > { %v221_v9 = vpop.permute.xlu0 %220 }
  0xbf   : > { %v216_v16 = vpop.permute.xlu0 %215 }
 0x116   : > { %v436_v10 = vpop.f32.mrb[0].mxu0 }
 0x117   : > { %v302_v11 = vadd.f32 %v436_v10, %v221_v9  ;;  %v296_v12 = vpop.f32.mrb[1].mxu0 }
 0x118   : > { %v297_v17 = vadd.f32 %v296_v12, %v216_v16 }
 0x119   : > { %v418_v13 = vmul.f32 -1.442695, %v302_v11 }
 0x11b   : > { %510 = vpow2.f32 %v418_v13 }
 0x125   : > { %v511_v14 = vpop.eup %510 }
 0x126   : > { %v308_v15 = vadd.f32 1.0, %v511_v14 }
 0x128   : > { %512 = vrcp.f32 %v308_v15 }
 0x132   : > { %v513_v18 = vpop.eup %512 }
 0x133   : > { %v311_v19 = vmul.f32 %v513_v18, %v297_v17 }
 0x135   : > { %312 = vst [vmem:[%s205_s5] sm:$0xff] %v311_v19 }
 0x136   : > { %557 = shalt.err (!%p554_p4)
}
 0x137   : > { %s558_s11 = scalar_lea.hbm %s792_s19, 128  ;;  %s562_s22 = scalar_lea.hbm %s844_s3, 256 }
 0x138   : > { %p559_p6 = scmp.ne.s32.totalorder %s792_s19, %s558_s11  ;;  %p563_p12 = scmp.lt.u32.totalorder %s792_s19, %s844_s3 }
 0x139   : > { %p564_p1 = scmp.lt.u32.totalorder %s562_s22, %s558_s11  ;;  %p566_p8 = scmp.lt.u32.totalorder %s558_s11, %s792_s19 }
 0x13a   : > { %p560_p7 = pnand %p559_p6, %p852_p9 }
 0x13b   : > { %p565_p3 = por %p564_p1, %p563_p12 }
 0x13c   : > { %p561_p10 = pneg %p560_p7 }
 0x13d   : > { %p567_p11 = por %p566_p8, %p565_p3 }
 0x13f   : > { %p568_p0 = pnand %p567_p11, %p561_p10 }
 0x141   : > { %571 = shalt.err (!%p568_p0)
}
 0x142   : > { %446 = dma.vmem_to_hbm [thread:$0]  (%p852_p9), %s794_s6, 128, %s792_s19, %s314_s21  }
 0x143 PF: > { %s340_s29 = sand.u32 1, %s606_s12   ;;  %p853_p5 = scmp.ne.s32.totalorder %s849_s27, 0 }
 0x144   : > { %p854_p13 = scmp.ge.s32.totalorder %s626_s17, 2  ;;  %s341_s30 = scalar_lea.sflag [#allocation4], %s340_s29 }
 0x146   : > { %p453_p2 = pnand %p854_p13, %p853_p5 }
 0x148   : > { %601 = dma.done.wait (!%p453_p2), %s341_s30, 128  }
 0x149   : > { %603 = vsyncadd (!%p453_p2), %s341_s30, 4294967168  ;;  %s19_s17 = sadd.s32 1, %s626_s17   ;;  %s855_s12 = smov %s610_s13 }
 0x14a   : > { %p16_p4 = scmp.ge.s32.totalorder %s19_s17, 4   ;;  %s856_s13 = smov %s614_s14 }
 0x14b   : > { %s857_s14 = smov %s709_s26  ;;  %s858_s15 = smov %s622_s16 }
 0x14c   : > { %s859_s16 = smov %s861_s20  ;;  %18 = sbr.rel (!%p16_p4) target bundleno = 6 (0x6), region = 77 }
 0x153   :  { %346 = vsyncpa [#allocation3], 1 }
 0x154   :  { %348 = vsyncpa [#allocation3 + $0x1], 1 }
 0x155   :  { %349 = vsyncpa [#allocation4], 1 }
 0x156   :  { %351 = vsyncpa [#allocation4 + $0x1], 1 }

</bundles_post_ra>
